<compile_context>
chip_gen: v6e
topology: v6e:2x2x1
jax: 0.10.0
libtpu: 0.0.40
codegen_flags: <defaults>
</compile_context>

<pallas_src>
import functools

import jax
import jax.numpy as jnp
from jax import lax
from jax.experimental import pallas as pl
from jax.experimental.pallas import tpu as pltpu


_LANES = 128
_SUBLANES = 8


def _round_up(a, b):
    return -(-a // b) * b


# ----------------------------------------------------------------------------
# Kernel: per-block focal loss -> (1, 128) partial sum (no carried state)
# ----------------------------------------------------------------------------
def _focal_loss_kernel(logits_ref, targets_ref, out_ref, *,
                       alpha, gamma, valid_in_last):
    """logits_ref / targets_ref: (block_rows, 128) blocks (native dtype).
    out_ref: (1, 128) f32 per-block partial sum."""
    i = pl.program_id(0)
    num_blocks = pl.num_programs(0)
    blk_rows, lanes = logits_ref.shape

    x = logits_ref[...].astype(jnp.float32)
    t = targets_ref[...].astype(jnp.float32)

    # sigmoid (EUP exp + divide)
    probs = 1.0 / (1.0 + jnp.exp(-x))

    # Folded forms (constants folded at trace time):
    #   p_t      = probs*t + (1-probs)*(1-t)        = (1-t) + probs*(2t-1)
    #   -alpha_t = -(alpha*t + (1-alpha)*(1-t))     = (alpha-1) + (1-2*alpha)*t
    p_t = (1.0 - t) + probs * (2.0 * t - 1.0)
    neg_alpha_t = (alpha - 1.0) + (1.0 - 2.0 * alpha) * t

    one_minus = 1.0 - p_t
    # (1 - p_t) ** gamma, specialized at trace time.
    if gamma == 0.0:
        focal_w = None                                  # weight == 1
    elif gamma == int(gamma) and 0 < int(gamma) <= 4:
        focal_w = one_minus                             # repeated VPU multiply
        for _ in range(int(gamma) - 1):
            focal_w = focal_w * one_minus
    else:
        # Generic pow via exp/log with an exact-zero guard (0 ** gamma == 0).
        focal_w = jnp.where(
            one_minus > 0.0,
            jnp.exp(gamma * jnp.log(jnp.maximum(one_minus, 1e-38))),
            0.0)

    log_p_t = jnp.log(jnp.maximum(p_t, 1e-8))           # clamp(min=eps)
    loss = neg_alpha_t * log_p_t
    if focal_w is not None:
        loss = loss * focal_w

    if valid_in_last < blk_rows * lanes:
        # Padding exists, but only the final grid block can contain padded /
        # out-of-bounds elements; keep the steady state mask-free.
        @pl.when(i == num_blocks - 1)
        def _():
            row = lax.broadcasted_iota(jnp.int32, (blk_rows, lanes), 0)
            col = lax.broadcasted_iota(jnp.int32, (blk_rows, lanes), 1)
            masked = jnp.where(row * lanes + col < valid_in_last, loss, 0.0)
            out_ref[...] = jnp.sum(masked, axis=0, keepdims=True)

        @pl.when(i != num_blocks - 1)
        def _():
            out_ref[...] = jnp.sum(loss, axis=0, keepdims=True)
    else:
        out_ref[...] = jnp.sum(loss, axis=0, keepdims=True)


# ----------------------------------------------------------------------------
# Wrapper: minimal layout plumbing + pallas_call + tiny final reduce
# ----------------------------------------------------------------------------
def focal_loss(logits, targets, alpha=1.0, gamma=2.0, reduction="mean",
               block_rows=1024):
    """Matches FocalLoss.forward: logits [B,1] (or [B]), targets [B] or [B,1]."""
    if reduction not in ("mean", "sum"):
        raise ValueError("reduction must be 'mean' or 'sum'")

    x = logits.reshape(-1)
    t = targets.reshape(-1)
    if x.shape[0] != t.shape[0]:
        raise ValueError("logits and targets must have the same element count")
    n = x.shape[0]

    # Keep native dtypes (no extra HBM cast pass); only normalize exotic ones.
    if x.dtype not in (jnp.dtype(jnp.float32), jnp.dtype(jnp.bfloat16)):
        x = x.astype(jnp.float32)
    if t.dtype not in (jnp.dtype(jnp.float32), jnp.dtype(jnp.bfloat16),
                       jnp.dtype(jnp.int32)):
        t = t.astype(jnp.float32)

    # Sublane granule of the widest-packing input dtype (f32/i32 -> 8, bf16 -> 16).
    align = max(_SUBLANES, 32 // x.dtype.itemsize, 32 // t.dtype.itemsize)

    rows = pl.cdiv(n, _LANES)
    rows_p = _round_up(rows, align)

    # Tile size: big enough to amortize the ~0.35us per-grid-step overhead,
    # capped so 2 inputs x 2 pipeline buffers stay far inside v5e's 16 MiB
    # default scoped VMEM (2048 x 128 x 4B x 4 buffers = 4 MiB worst case).
    block_rows = _round_up(max(1, min(block_rows, 2048, rows_p)), align)

    grid = pl.cdiv(rows_p, block_rows)

    # Pad only up to the vreg granule; the (partial) last block is masked
    # in-kernel, so the pad value does not matter.
    n_pad = rows_p * _LANES
    if n_pad != n:
        x = jnp.pad(x, (0, n_pad - n))
        t = jnp.pad(t, (0, n_pad - n))
    x = x.reshape(rows_p, _LANES)
    t = t.reshape(rows_p, _LANES)

    valid_in_last = n - (grid - 1) * block_rows * _LANES
    kernel = functools.partial(
        _focal_loss_kernel,
        alpha=float(alpha), gamma=float(gamma),
        valid_in_last=int(valid_in_last))

    partials = pl.pallas_call(
        kernel,
        out_shape=jax.ShapeDtypeStruct((grid, _LANES), jnp.float32),
        grid_spec=pltpu.PrefetchScalarGridSpec(
            num_scalar_prefetch=0,
            grid=(grid,),
            in_specs=[
                pl.BlockSpec((block_rows, _LANES), lambda i: (i, 0)),
                pl.BlockSpec((block_rows, _LANES), lambda i: (i, 0)),
            ],
            out_specs=pl.BlockSpec((1, _LANES), lambda i: (i, 0)),
        ),
        compiler_params=pltpu.CompilerParams(
            dimension_semantics=("parallel",)),  # no carried state -> both TCs
    )(x, t)

    total = jnp.sum(partials)                    # tiny (grid, 128) reduce
    if reduction == "mean":
        total = total / jnp.float32(n)
    return total


# ----------------------------------------------------------------------------
# Pure-JAX reference (mirrors the PyTorch module line by line)
# ----------------------------------------------------------------------------
def focal_loss_reference(logits, targets, alpha=1.0, gamma=2.0,
                         reduction="mean"):
    t = targets.reshape(-1, 1).astype(jnp.float32)
    x = logits.reshape(-1, 1).astype(jnp.float32)
    probs = jax.nn.sigmoid(x)
    p_t = probs * t + (1.0 - probs) * (1.0 - t)
    alpha_t = alpha * t + (1.0 - alpha) * (1.0 - t)
    log_p_t = jnp.log(jnp.clip(p_t, 1e-8, None))
    loss = -alpha_t * (1.0 - p_t) ** gamma * log_p_t
    return loss.mean() if reduction == "mean" else loss.sum()


if __name__ == "__main__":
    key = jax.random.PRNGKey(0)
    k1, k2, k3, k4 = jax.random.split(key, 4)

    # Batch that is NOT a multiple of the lane width, to exercise tail masking.
    B = 300
    logits = 2.0 * jax.random.normal(k1, (B, 1), jnp.float32)
    targets = jax.random.bernoulli(k2, 0.5, (B,)).astype(jnp.int32)

    cases = [
        dict(alpha=1.0, gamma=2.0, reduction="mean"),   # module defaults
        dict(alpha=0.25, gamma=2.0, reduction="mean"),
        dict(alpha=0.75, gamma=1.5, reduction="sum"),   # non-integer gamma path
    ]
    for cfg in cases:
        got = jax.block_until_ready(
            jax.jit(functools.partial(focal_loss, **cfg))(logits, targets))
        want = focal_loss_reference(logits, targets, **cfg)
        assert got.shape == ()
        assert bool(jnp.allclose(got, want, rtol=1e-4, atol=1e-6)), \
            (cfg, got, want)

    # Tiny [B, 1] case like a single training micro-batch.
    B2 = 2
    logits2 = jax.random.normal(k3, (B2, 1), jnp.float32)
    targets2 = jax.random.bernoulli(k4, 0.5, (B2, 1)).astype(jnp.float32)
    got2 = jax.block_until_ready(focal_loss(logits2, targets2))
    want2 = focal_loss_reference(logits2, targets2)
    assert bool(jnp.allclose(got2, want2, rtol=1e-4, atol=1e-6)), (got2, want2)

    print("KERNEL_OK")
</pallas_src>

<mosaic_0001>
module attributes {stable_mosaic.version = 11 : i64} {
  func.func @_focal_loss_kernel(%arg0: i32, %arg1: memref<8x128xf32, #tpu.memory_space<vmem>>, %arg2: memref<8x128xi32, #tpu.memory_space<vmem>>, %arg3: memref<1x128xf32, #tpu.memory_space<vmem>>) attributes {dimension_semantics = [#tpu.dimension_semantics<parallel>], iteration_bounds = array<i64: 1>, scalar_prefetch = 0 : i64, scratch_operands = 0 : i64, tpu.core_type = #tpu.core_type<tc>, window_params = [{transform_indices = @transform_0, window_bounds = array<i64: 8, 128>}, {transform_indices = @transform_1, window_bounds = array<i64: 8, 128>}, {transform_indices = @transform_2, window_bounds = array<i64: 1, 128>}]} {
    %c0 = arith.constant 0 : index
    %c0_0 = arith.constant 0 : index
    %0 = vector.load %arg1[%c0, %c0_0] : memref<8x128xf32, #tpu.memory_space<vmem>>, vector<8x128xf32>
    %c0_1 = arith.constant 0 : index
    %c0_2 = arith.constant 0 : index
    %1 = vector.load %arg2[%c0_1, %c0_2] : memref<8x128xi32, #tpu.memory_space<vmem>>, vector<8x128xi32>
    %2 = arith.sitofp %1 : vector<8x128xi32> to vector<8x128xf32>
    %cst = arith.constant 0.000000e+00 : f32
    %3 = vector.broadcast %cst : f32 to vector<8x128xf32>
    %4 = arith.subf %3, %0 : vector<8x128xf32>
    %5 = math.exp %4 : vector<8x128xf32>
    %cst_3 = arith.constant 1.000000e+00 : f32
    %6 = vector.broadcast %cst_3 : f32 to vector<8x128xf32>
    %7 = arith.addf %6, %5 : vector<8x128xf32>
    %cst_4 = arith.constant 1.000000e+00 : f32
    %8 = vector.broadcast %cst_4 : f32 to vector<8x128xf32>
    %9 = arith.divf %8, %7 : vector<8x128xf32>
    %cst_5 = arith.constant 1.000000e+00 : f32
    %10 = vector.broadcast %cst_5 : f32 to vector<8x128xf32>
    %11 = arith.subf %10, %2 : vector<8x128xf32>
    %cst_6 = arith.constant 2.000000e+00 : f32
    %12 = vector.broadcast %cst_6 : f32 to vector<8x128xf32>
    %13 = arith.mulf %12, %2 : vector<8x128xf32>
    %cst_7 = arith.constant 1.000000e+00 : f32
    %14 = vector.broadcast %cst_7 : f32 to vector<8x128xf32>
    %15 = arith.subf %13, %14 : vector<8x128xf32>
    %16 = arith.mulf %9, %15 : vector<8x128xf32>
    %17 = arith.addf %11, %16 : vector<8x128xf32>
    %cst_8 = arith.constant -1.000000e+00 : f32
    %18 = vector.broadcast %cst_8 : f32 to vector<8x128xf32>
    %19 = arith.mulf %18, %2 : vector<8x128xf32>
    %cst_9 = arith.constant 0.000000e+00 : f32
    %20 = vector.broadcast %cst_9 : f32 to vector<8x128xf32>
    %21 = arith.addf %20, %19 : vector<8x128xf32>
    %cst_10 = arith.constant 1.000000e+00 : f32
    %22 = vector.broadcast %cst_10 : f32 to vector<8x128xf32>
    %23 = arith.subf %22, %17 : vector<8x128xf32>
    %24 = arith.mulf %23, %23 : vector<8x128xf32>
    %cst_11 = arith.constant 9.99999993E-9 : f32
    %25 = vector.broadcast %cst_11 : f32 to vector<8x128xf32>
    %26 = arith.maximumf %17, %25 : vector<8x128xf32>
    %27 = math.log %26 : vector<8x128xf32>
    %28 = arith.mulf %21, %27 : vector<8x128xf32>
    %29 = arith.mulf %28, %24 : vector<8x128xf32>
    %c0_i32 = arith.constant 0 : i32
    %30 = arith.cmpi eq, %arg0, %c0_i32 : i32
    %31 = arith.extui %30 : i1 to i32
    %c0_i32_12 = arith.constant 0 : i32
    %32 = arith.cmpi ne, %31, %c0_i32_12 : i32
    scf.if %32 {
      %36 = tpu.iota {dimensions = array<i32: 0>} : vector<8x128xi32>
      %37 = tpu.iota {dimensions = array<i32: 1>} : vector<8x128xi32>
      %c128_i32 = arith.constant 128 : i32
      %38 = vector.broadcast %c128_i32 : i32 to vector<8x128xi32>
      %39 = arith.muli %36, %38 : vector<8x128xi32>
      %40 = arith.addi %39, %37 : vector<8x128xi32>
      %c300_i32 = arith.constant 300 : i32
      %41 = vector.broadcast %c300_i32 : i32 to vector<8x128xi32>
      %42 = arith.cmpi slt, %40, %41 : vector<8x128xi32>
      %cst_15 = arith.constant 0.000000e+00 : f32
      %43 = vector.broadcast %cst_15 : f32 to vector<8x128xf32>
      %44 = arith.select %42, %29, %43 : vector<8x128xi1>, vector<8x128xf32>
      %cst_16 = arith.constant dense<0.000000e+00> : vector<128xf32>
      %45 = vector.multi_reduction <add>, %44, %cst_16 [0] : vector<8x128xf32> to vector<128xf32>
      %46 = vector.shape_cast %45 : vector<128xf32> to vector<1x128xf32>
      %c0_17 = arith.constant 0 : index
      %c0_18 = arith.constant 0 : index
      %47 = vector.load %arg3[%c0_17, %c0_18] : memref<1x128xf32, #tpu.memory_space<vmem>>, vector<1x128xf32>
      tpu.vector_store %arg3[%c0_17, %c0_18], %46 {strides = array<i32>} : memref<1x128xf32, #tpu.memory_space<vmem>>, vector<1x128xf32>,
    } else {
    }
    %c0_i32_13 = arith.constant 0 : i32
    %33 = arith.cmpi ne, %arg0, %c0_i32_13 : i32
    %34 = arith.extui %33 : i1 to i32
    %c0_i32_14 = arith.constant 0 : i32
    %35 = arith.cmpi ne, %34, %c0_i32_14 : i32
    scf.if %35 {
      %cst_15 = arith.constant dense<0.000000e+00> : vector<128xf32>
      %36 = vector.multi_reduction <add>, %29, %cst_15 [0] : vector<8x128xf32> to vector<128xf32>
      %37 = vector.shape_cast %36 : vector<128xf32> to vector<1x128xf32>
      %c0_16 = arith.constant 0 : index
      %c0_17 = arith.constant 0 : index
      %38 = vector.load %arg3[%c0_16, %c0_17] : memref<1x128xf32, #tpu.memory_space<vmem>>, vector<1x128xf32>
      tpu.vector_store %arg3[%c0_16, %c0_17], %37 {strides = array<i32>} : memref<1x128xf32, #tpu.memory_space<vmem>>, vector<1x128xf32>,
    } else {
    }
    return
  }
  func.func @transform_0(%arg0: i32) -> (i32, i32) {
    %c0_i32 = arith.constant 0 : i32
    %c0_i32_0 = arith.constant 0 : i32
    return %arg0, %c0_i32 : i32, i32
  }
  func.func @transform_1(%arg0: i32) -> (i32, i32) {
    %c0_i32 = arith.constant 0 : i32
    %c0_i32_0 = arith.constant 0 : i32
    return %arg0, %c0_i32 : i32, i32
  }
  func.func @transform_2(%arg0: i32) -> (i32, i32) {
    %c0_i32 = arith.constant 0 : i32
    %c0_i32_0 = arith.constant 0 : i32
    return %arg0, %c0_i32 : i32, i32
  }
}

</mosaic_0001>

<bundles_post_ra>
// kernel: focal_loss.1
= control target key start
LH: loop header
LB: loop body
LE: loop exit
PB: predicated region body
PF: predicated region fallthrough
CT: control target
= control target key end

     0   :  { %v38_v14 = vlaneseq  ;;  %s99_s0 = inlined_call_operand.vmem [shape: f32[8,128], index: 0, kind: input, shape index: {}]   ;;  %s100_s1 = inlined_call_operand.vmem [shape: s32[8,128], index: 1, kind: input, shape index: {}]   ;;  %s101_s2 = inlined_call_operand.vmem [shape: f32[1,128], index: 2, kind: output, shape index: {}]  }
   0x1   :  { %v11_v0 = vld [vmem:[%s99_s0] sm:$0xff] }
   0x2   :  { %v14_v1 = vsub.f32 0.0, %v11_v0  ;;  %v12_v5 = vld [vmem:[%s100_s1] sm:$0xff]  ;;  %v39_v15 = vshrl.u32 %v38_v14, 7  ;;  %v41_v16 = vand.u32 127, %v38_v14 }
   0x3   :  { %v13_v6 = vcvt.s32.f32 %v12_v5 }
   0x4   :  { %v15_v2 = vmul.f32 1.442695, %v14_v1  ;;  %v42_v17 = vmul.u32 128, %v39_v15 }
   0x5   :  { %v21_v7 = vmul.f32 2.0, %v13_v6  ;;  %v20_v9 = vsub.f32 1.0, %v13_v6  ;;  %v25_v19 = vmul.f32 -1.0, %v13_v6 }
   0x6   :  { %69 = vpow2.f32 %v15_v2  ;;  %v43_v21 = vadd.s32 %v42_v17, %v41_v16 }
   0x7   :  { %v68_v8 = vadd.f32 -1.0, %v21_v7 }
   0x8   :  { %vm44_vm0 = vcmp.lt.s32.totalorder %v43_v21, 300 }
  0x13   :  { %v70_v3 = vpop.eup %69 }
  0x14   :  { %v17_v4 = vadd.f32 1.0, %v70_v3 }
  0x16   :  { %71 = vrcp.f32 %v17_v4 }
  0x23   :  { %v72_v10 = vpop.eup %71 }
  0x24   :  { %v23_v11 = vmul.f32 %v72_v10, %v68_v8 }
  0x26   :  { %v24_v12 = vadd.f32 %v23_v11, %v20_v9 }
  0x28   :  { %v29_v13 = vmax.f32 %v24_v12, 1e-08  ;;  %v27_v18 = vsub.f32 1.0, %v24_v12 }
  0x2a   :  { %73 = vlog2.f32 %v29_v13  ;;  %v28_v22 = vmul.f32 %v27_v18, %v27_v18 }
  0x37   :  { %v74_v20 = vpop.eup %73 }
  0x38   :  { %v31_v23 = vmul.f32 0.6931472, %v74_v20 }
  0x3a   :  { %v32_v24 = vmul.f32 %v31_v23, %v25_v19 }
  0x3c   :  { %v33_v25 = vmul.f32 %v32_v24, %v28_v22 }
  0x3e   :  { %v45_v26 = vsel %vm44_vm0, %v33_v25, 0.0 }
  0x3f   :  { %v46_v27 = vrot.slane %v45_v26, 4 }
  0x41   :  { %v47_v28 = vadd.f32 %v46_v27, %v45_v26 }
  0x43   :  { %v48_v29 = vrot.slane %v47_v28, 2 }
  0x45   :  { %v49_v30 = vadd.f32 %v48_v29, %v47_v28 }
  0x47   :  { %v50_v31 = vrot.slane %v49_v30, 1 }
  0x49   :  { %v51_v32 = vadd.f32 %v50_v31, %v49_v30 }
  0x4b   :  { %52 = vst [vmem:[%s101_s2] sm:$0x1] %v51_v32 }

</bundles_post_ra>
